<compile_context>
chip_gen: v7x
topology: tpu7x:2x2x1
jax: 0.10.0
libtpu: 0.0.40
codegen_flags: <defaults>
</compile_context>

<pallas_src>
import jax
import jax.numpy as jnp
from jax.experimental import pallas as pl
from jax.experimental.pallas import tpu as pltpu

_LANE = 128
_SUBLANE_BF16 = 16        # bf16 packs 16 sublanes per vreg; keep tiles multiples of 16
_NEG_INF = -1e30          # bias for padded (fake) classes -> softmax prob exactly 0


def _round_up(x, m):
    return ((x + m - 1) // m) * m


def perceptron_kernel(x_ref, w1_ref, b1_ref, w2_ref, b2_ref, o_ref):
    # x_ref:  (TB, IN)   any float dtype (cast to bf16 for the MXU below)
    # w1_ref: (IN, Hp)   bf16       b1_ref: (1, Hp) f32
    # w2_ref: (Hp, Cp)   bf16       b2_ref: (1, Cp) f32 (padded classes = -1e30)
    # o_ref:  (TB, Cp)   bf16
    x = x_ref[...].astype(w1_ref.dtype)  # bf16 operands for the MXU

    # fc1 (f32 accumulation) + bias + ReLU
    h = jnp.dot(x, w1_ref[...], preferred_element_type=jnp.float32) + b1_ref[...]
    h = jnp.maximum(h, 0.0)

    # fc2 (bf16 MXU, f32 accumulation) + bias
    logits = jnp.dot(h.astype(w2_ref.dtype), w2_ref[...],
                     preferred_element_type=jnp.float32) + b2_ref[...]

    # Softmax over classes (eval mode).  Padded classes have logit -1e30 ->
    # exp underflows to exactly 0, so no masking needed.
    m = jnp.max(logits, axis=1, keepdims=True)
    e = jnp.exp(logits - m)
    s = jnp.sum(e, axis=1, keepdims=True)
    o_ref[...] = (e * pl.reciprocal(s, approx=True)).astype(o_ref.dtype)


def prepare_params(w1, b1, w2, b2, *, compute_dtype=jnp.bfloat16):
    """One-time parameter prep (NOT in the per-call forward path).

    PyTorch layout in: w1 [H, IN], b1 [H], w2 [C, H], b2 [C].
    Returns [in, out] weights padded so H and C are multiples of 128 (lane
    dense), weights in bf16, biases in f32, padded class bias set to -1e30.
    """
    H, IN = w1.shape
    C = w2.shape[0]
    H_p = _round_up(H, _LANE)
    C_p = _round_up(C, _LANE)

    w1_t = jnp.zeros((IN, H_p), compute_dtype).at[:, :H].set(
        jnp.asarray(w1).T.astype(compute_dtype))
    b1_p = jnp.zeros((1, H_p), jnp.float32).at[0, :H].set(
        jnp.asarray(b1).astype(jnp.float32))
    w2_t = jnp.zeros((H_p, C_p), compute_dtype).at[:H, :C].set(
        jnp.asarray(w2).T.astype(compute_dtype))
    b2_p = jnp.full((1, C_p), _NEG_INF, jnp.float32).at[0, :C].set(
        jnp.asarray(b2).astype(jnp.float32))
    return {"w1": w1_t, "b1": b1_p, "w2": w2_t, "b2": b2_p, "num_classes": C}


def _resident_spec(block_shape):
    """Grid-invariant (weight/bias) block: constant index_map, single-buffered."""
    try:
        return pl.BlockSpec(block_shape, lambda i: (0, 0),
                            pipeline_mode=pl.Buffered(1))
    except TypeError:  # older jax without pipeline_mode on BlockSpec
        return pl.BlockSpec(block_shape, lambda i: (0, 0))


def perceptron_forward(x, params, *, tile_b=None, out_dtype=jnp.bfloat16,
                       trim_output=True, vmem_limit_bytes=32 * 1024 * 1024):
    """x: [B, IN]; params from prepare_params(). Returns softmax probs.

    trim_output=True  -> [B, C] (extra XLA slice pass over the output)
    trim_output=False -> padded lane-dense [B_pad, C_p] slab (fake classes are
                         exact zeros; padded batch rows are garbage-but-finite).
    """
    w1, b1, w2, b2 = params["w1"], params["b1"], params["w2"], params["b2"]
    C = params["num_classes"]
    B, IN = x.shape
    assert w1.shape[0] == IN, "input feature dim mismatch"
    H_p = w1.shape[1]
    C_p = w2.shape[1]

    xbytes = jnp.dtype(x.dtype).itemsize
    obytes = jnp.dtype(out_dtype).itemsize
    wbytes = jnp.dtype(w1.dtype).itemsize
    param_bytes = (w1.size + w2.size) * wbytes + (b1.size + b2.size) * 4

    if tile_b is None:
        # Per-row VMEM footprint: double-buffered x / out tiles plus the f32
        # and bf16 intermediates (bf16 x cast, f32+bf16 h, f32 logits/exp/probs)
        # live during compute.  Params are single-buffered -> 1x param_bytes.
        row_bytes = (2 * IN * xbytes            # x tile (double-buffered)
                     + 2 * C_p * obytes         # out tile (double-buffered)
                     + IN * 2                   # bf16 cast of x
                     + H_p * (4 + 2)            # f32 h + bf16 h
                     + C_p * (4 + 4 + 4))       # f32 logits, exp, probs
        budget = max(vmem_limit_bytes * 3 // 4 - param_bytes, 1 << 20)
        tile_b = min(2048, max(budget // row_bytes, _SUBLANE_BF16))
        # Keep >= 2 grid steps whenever the batch allows it: v7x shards the
        # "parallel" batch axis across both TensorCores, and the x-tile DMA
        # pipelines against compute.
        if B > _SUBLANE_BF16:
            tile_b = min(tile_b, _round_up(pl.cdiv(B, 2), _SUBLANE_BF16))
    tile_b = max(_SUBLANE_BF16, _round_up(int(tile_b), _SUBLANE_BF16))

    # Handle ragged batches by zero-padding up to a tile multiple.
    B_pad = _round_up(B, tile_b)
    if B_pad != B:
        x = jnp.pad(x, ((0, B_pad - B), (0, 0)))
    grid = (B_pad // tile_b,)

    cost = pl.CostEstimate(
        flops=2 * B_pad * (IN * H_p + H_p * C_p),
        transcendentals=B_pad * C_p,
        bytes_accessed=(B_pad * IN * xbytes + param_bytes + B_pad * C_p * obytes),
    )

    out = pl.pallas_call(
        perceptron_kernel,
        out_shape=jax.ShapeDtypeStruct((B_pad, C_p), out_dtype),
        grid_spec=pltpu.PrefetchScalarGridSpec(
            num_scalar_prefetch=0,
            grid=grid,
            in_specs=[
                pl.BlockSpec((tile_b, IN), lambda i: (i, 0)),
                _resident_spec((IN, H_p)),
                _resident_spec((1, H_p)),
                _resident_spec((H_p, C_p)),
                _resident_spec((1, C_p)),
            ],
            out_specs=pl.BlockSpec((tile_b, C_p), lambda i: (i, 0)),
        ),
        compiler_params=pltpu.CompilerParams(
            dimension_semantics=("parallel",),
            vmem_limit_bytes=vmem_limit_bytes,
        ),
        cost_estimate=cost,
    )(x, w1, b1, w2, b2)

    if trim_output:
        # Drop batch padding and fake class columns (kernel writes exact zeros
        # in the fake columns).
        return out[:B, :C]
    return out


if __name__ == "__main__":
    # Small shapes consistent with the module: x is [batch, input_size].
    B, IN, H, C = 512, 32, 64, 16

    key = jax.random.PRNGKey(0)
    kx, kw1, kb1, kw2, kb2 = jax.random.split(key, 5)

    x = jax.random.normal(kx, (B, IN), dtype=jnp.float32)
    # PyTorch nn.Linear layout: weight [out, in], bias [out].
    w1 = jax.random.normal(kw1, (H, IN), dtype=jnp.float32) * (1.0 / jnp.sqrt(IN))
    b1 = jax.random.normal(kb1, (H,), dtype=jnp.float32) * 0.01
    w2 = jax.random.normal(kw2, (C, H), dtype=jnp.float32) * (1.0 / jnp.sqrt(H))
    b2 = jax.random.normal(kb2, (C,), dtype=jnp.float32) * 0.01

    params = prepare_params(w1, b1, w2, b2)          # one-time transpose/pad/cast
    out = jax.block_until_ready(perceptron_forward(x, params))

    # Reference along the same numerics path (bf16 matmuls, f32 accumulation).
    xb, w1b, w2b = (a.astype(jnp.bfloat16) for a in (x, w1, w2))
    h_ref = jnp.maximum(
        jnp.dot(xb, w1b.T, preferred_element_type=jnp.float32) + b1, 0.0)
    logits_ref = jnp.dot(h_ref.astype(jnp.bfloat16), w2b.T,
                         preferred_element_type=jnp.float32) + b2
    ref = jax.nn.softmax(logits_ref, axis=1)

    out_f32 = out.astype(jnp.float32)
    assert out.shape == (B, C)
    assert out.dtype == jnp.bfloat16
    assert jnp.allclose(out_f32.sum(axis=1), 1.0, atol=1e-2)   # approx recip + bf16 out
    assert jnp.allclose(out_f32, ref, atol=1e-2, rtol=0.0)

    print("KERNEL_OK")
</pallas_src>

<mosaic_0001>
module attributes {stable_mosaic.version = 11 : i64} {
  func.func @perceptron_kernel(%arg0: i32, %arg1: memref<256x32xf32, #tpu.memory_space<vmem>>, %arg2: memref<32x128xbf16, #tpu.memory_space<vmem>>, %arg3: memref<1x128xf32, #tpu.memory_space<vmem>>, %arg4: memref<128x128xbf16, #tpu.memory_space<vmem>>, %arg5: memref<1x128xf32, #tpu.memory_space<vmem>>, %arg6: memref<256x128xbf16, #tpu.memory_space<vmem>>) attributes {dimension_semantics = [#tpu.dimension_semantics<parallel>], iteration_bounds = array<i64: 2>, scalar_prefetch = 0 : i64, scratch_operands = 0 : i64, tpu.core_type = #tpu.core_type<tc>, window_params = [{transform_indices = @transform_0, window_bounds = array<i64: 256, 32>}, {pipeline_mode = #tpu.pipeline_mode<synchronous>, transform_indices = @transform_1, window_bounds = array<i64: 32, 128>}, {pipeline_mode = #tpu.pipeline_mode<synchronous>, transform_indices = @transform_2, window_bounds = array<i64: 1, 128>}, {pipeline_mode = #tpu.pipeline_mode<synchronous>, transform_indices = @transform_3, window_bounds = array<i64: 128, 128>}, {pipeline_mode = #tpu.pipeline_mode<synchronous>, transform_indices = @transform_4, window_bounds = array<i64: 1, 128>}, {transform_indices = @transform_5, window_bounds = array<i64: 256, 128>}]} {
    %c0 = arith.constant 0 : index
    %c0_0 = arith.constant 0 : index
    %0 = vector.load %arg1[%c0, %c0_0] : memref<256x32xf32, #tpu.memory_space<vmem>>, vector<256x32xf32>
    %1 = arith.truncf %0 : vector<256x32xf32> to vector<256x32xbf16>
    %c0_1 = arith.constant 0 : index
    %c0_2 = arith.constant 0 : index
    %2 = vector.load %arg2[%c0_1, %c0_2] : memref<32x128xbf16, #tpu.memory_space<vmem>>, vector<32x128xbf16>
    %cst = arith.constant dense<0.000000e+00> : vector<256x128xf32>
    %3 = tpu.matmul %1, %2, %cst {dimension_numbers = #tpu.dot_dimension_numbers<[1], [0], [0], [1], [0, 0, 1, 1], [], []>} : vector<256x32xbf16>, vector<32x128xbf16>, vector<256x128xf32> -> vector<256x128xf32>
    %c0_3 = arith.constant 0 : index
    %c0_4 = arith.constant 0 : index
    %4 = vector.load %arg3[%c0_3, %c0_4] : memref<1x128xf32, #tpu.memory_space<vmem>>, vector<1x128xf32>
    %5 = vector.broadcast %4 : vector<1x128xf32> to vector<256x128xf32>
    %6 = arith.addf %3, %5 : vector<256x128xf32>
    %cst_5 = arith.constant 0.000000e+00 : f32
    %7 = vector.broadcast %cst_5 : f32 to vector<256x128xf32>
    %8 = arith.maximumf %6, %7 : vector<256x128xf32>
    %9 = arith.truncf %8 : vector<256x128xf32> to vector<256x128xbf16>
    %c0_6 = arith.constant 0 : index
    %c0_7 = arith.constant 0 : index
    %10 = vector.load %arg4[%c0_6, %c0_7] : memref<128x128xbf16, #tpu.memory_space<vmem>>, vector<128x128xbf16>
    %cst_8 = arith.constant dense<0.000000e+00> : vector<256x128xf32>
    %11 = tpu.matmul %9, %10, %cst_8 {dimension_numbers = #tpu.dot_dimension_numbers<[1], [0], [0], [1], [0, 0, 1, 1], [], []>} : vector<256x128xbf16>, vector<128x128xbf16>, vector<256x128xf32> -> vector<256x128xf32>
    %c0_9 = arith.constant 0 : index
    %c0_10 = arith.constant 0 : index
    %12 = vector.load %arg5[%c0_9, %c0_10] : memref<1x128xf32, #tpu.memory_space<vmem>>, vector<1x128xf32>
    %13 = vector.broadcast %12 : vector<1x128xf32> to vector<256x128xf32>
    %14 = arith.addf %11, %13 : vector<256x128xf32>
    %cst_11 = arith.constant dense<0xFF800000> : vector<256xf32>
    %15 = vector.multi_reduction <maximumf>, %14, %cst_11 [1] : vector<256x128xf32> to vector<256xf32>
    %16 = vector.shape_cast %15 : vector<256xf32> to vector<256x1xf32>
    %17 = vector.broadcast %16 : vector<256x1xf32> to vector<256x128xf32>
    %18 = arith.subf %14, %17 : vector<256x128xf32>
    %19 = math.exp %18 : vector<256x128xf32>
    %cst_12 = arith.constant dense<0.000000e+00> : vector<256xf32>
    %20 = vector.multi_reduction <add>, %19, %cst_12 [1] : vector<256x128xf32> to vector<256xf32>
    %21 = vector.shape_cast %20 : vector<256xf32> to vector<256x1xf32>
    %22 = tpu.reciprocal %21 {approx = true} : vector<256x1xf32> -> vector<256x1xf32>
    %23 = vector.broadcast %22 : vector<256x1xf32> to vector<256x128xf32>
    %24 = arith.mulf %19, %23 : vector<256x128xf32>
    %25 = arith.truncf %24 : vector<256x128xf32> to vector<256x128xbf16>
    %c0_13 = arith.constant 0 : index
    %c0_14 = arith.constant 0 : index
    %26 = vector.load %arg6[%c0_13, %c0_14] : memref<256x128xbf16, #tpu.memory_space<vmem>>, vector<256x128xbf16>
    tpu.vector_store %arg6[%c0_13, %c0_14], %25 {strides = array<i32>} : memref<256x128xbf16, #tpu.memory_space<vmem>>, vector<256x128xbf16>,
    return
  }
  func.func @transform_0(%arg0: i32) -> (i32, i32) {
    %c0_i32 = arith.constant 0 : i32
    %c0_i32_0 = arith.constant 0 : i32
    return %arg0, %c0_i32 : i32, i32
  }
  func.func @transform_1(%arg0: i32) -> (i32, i32) {
    %c0_i32 = arith.constant 0 : i32
    %c0_i32_0 = arith.constant 0 : i32
    %c0_i32_1 = arith.constant 0 : i32
    return %c0_i32, %c0_i32_0 : i32, i32
  }
  func.func @transform_2(%arg0: i32) -> (i32, i32) {
    %c0_i32 = arith.constant 0 : i32
    %c0_i32_0 = arith.constant 0 : i32
    %c0_i32_1 = arith.constant 0 : i32
    return %c0_i32, %c0_i32_0 : i32, i32
  }
  func.func @transform_3(%arg0: i32) -> (i32, i32) {
    %c0_i32 = arith.constant 0 : i32
    %c0_i32_0 = arith.constant 0 : i32
    %c0_i32_1 = arith.constant 0 : i32
    return %c0_i32, %c0_i32_0 : i32, i32
  }
  func.func @transform_4(%arg0: i32) -> (i32, i32) {
    %c0_i32 = arith.constant 0 : i32
    %c0_i32_0 = arith.constant 0 : i32
    %c0_i32_1 = arith.constant 0 : i32
    return %c0_i32, %c0_i32_0 : i32, i32
  }
  func.func @transform_5(%arg0: i32) -> (i32, i32) {
    %c0_i32 = arith.constant 0 : i32
    %c0_i32_0 = arith.constant 0 : i32
    return %arg0, %c0_i32 : i32, i32
  }
}

</mosaic_0001>

<bundles_post_ra>
// kernel: tpu_custom_call.1
= control target key start
LH: loop header
LB: loop body
LE: loop exit
PB: predicated region body
PF: predicated region fallthrough
CT: control target
= control target key end

     0   :  { %10 = vsyncpa [#allocation3], 0  ;;  %s2465_s0 = inlined_call_operand.vmem [shape: f32[512,32], index: 0, kind: input, shape index: {}]   ;;  %s2466_s1 = inlined_call_operand.vmem [shape: bf16[32,128], index: 1, kind: input, shape index: {}]   ;;  %s2467_s2 = inlined_call_operand.vmem [shape: f32[1,128], index: 2, kind: input, shape index: {}]   ;;  %s2468_s3 = inlined_call_operand.vmem [shape: bf16[128,128], index: 3, kind: input, shape index: {}]   ;;  %s2469_s4 = inlined_call_operand.vmem [shape: f32[1,128], index: 4, kind: input, shape index: {}]   ;;  %s2470_s5 = inlined_call_operand.hbm [shape: bf16[512,128], index: 5, kind: output, shape index: {}]  }
   0x1   :  { %12 = vsyncpa [#allocation3 + $0x1], 0  ;;  %s1930_s18 = smov 0   ;;  %s1932_s19 = smov 0  }
   0x2   :  { %s1934_s20 = smov 0   ;;  %s1936_s21 = smov 0  }
   0x3 LB: > { %s1951_s22 = sadd.s32 4294967295, %s1895_s21   ;;  %s1312_s23 = sadd.s32 4294967294, %s1895_s21   ;;  %s1895_s21 = sphi %s1936_s21, %s2476_s21   ;;  %s1891_s20 = sphi %s1934_s20, %s2475_s20   ;;  %s1887_s19 = sphi %s1932_s19, %s2474_s19   ;;  %s1883_s18 = sphi %s1930_s18, %s2473_s18  }
   0x4   : > { %s1955_s24 = sadd.s32 1, %s1895_s21   ;;  %s135_s25 = sadd.s32 1, %s1891_s20 }
   0x5   : > { %s132_s26 = ssub.s32 %s1895_s21, %s1955_s24  ;;  %p145_p0 = scmp.ne.s32.totalorder %s1891_s20, %s1887_s19 }
   0x6   : > { %p133_p1 = scmp.eq.s32.totalorder %s132_s26, 0  ;;  %p146_p2 = scmp.eq.s32.totalorder %s1951_s22, 1 }
   0x7   : > { %p151_p3 = scmp.ne.s32.totalorder %s1887_s19, %s1883_s18  ;;  %p152_p4 = scmp.eq.s32.totalorder %s1312_s23, 1 }
   0x8   : > { %s1966_s27 = scalar_select %p133_p1, %s1891_s20, %s135_s25  }
   0x9   : > { %p1968_p5 = por %p146_p2, %p145_p0  ;;  %p1972_p6 = por %p152_p4, %p151_p3 }
   0xa   : > { %p1315_p7 = scmp.ge.s32.totalorder %s1895_s21, 1  ;;  %p191_p8 = scmp.lt.s32.totalorder %s1895_s21, 3 }
   0xc   : > { %p192_p9 = pnand %p1315_p7, %p191_p8 }
   0xd   : > { %v1695_v0 = vld [vmem:[%s2466_s1] sm:$0xff] (!%p192_p9)   ;;  %s1317_s7 = sshll.u32 (!%p192_p9), %s1951_s22, 5  ;;  %v1696_v1 = vld [vmem:[%s2466_s1 + $0x8] sm:$0xff] (!%p192_p9)   ;;  %v1699_v4 = vld [vmem:[%s2468_s3 + $0x10] sm:$0xff] (!%p192_p9)   ;;  %vm298_vm0 = vcmask (!%p192_p9), 261120   ;;  %s216_s23 = sand.u32 (!%p192_p9), 1, %s1887_s19  }
   0xe   : > { %195 = sbr.rel (%p192_p9) target bundleno = 857 (0x359), region = 40  ;;  %p220_p10 = scmp.lt.s32.totalorder (!%p192_p9), %s1317_s7, 63  ;;  %1554 = vmatprep.subr.bf16.mxu0 (!%p192_p9), %v1695_v0  ;;  %v1697_v2 = vld [vmem:[%s2468_s3] sm:$0xff] (!%p192_p9)   ;;  %v1698_v3 = vld [vmem:[%s2468_s3 + $0x8] sm:$0xff] (!%p192_p9)   ;;  %v1700_v16 = vld [vmem:[%s2468_s3 + $0x18] sm:$0xff] (!%p192_p9)  }
   0xf   : > { %1555 = vmatpush3.bf16.msra.mxu0 (!%p192_p9), %v1695_v0  ;;  %1638 = vmatprep.subr.bf16.mxu1 (!%p192_p9), %v1697_v2  ;;  %v1701_v21 = vld [vmem:[%s2468_s3 + $0x20] sm:$0xff] (!%p192_p9)   ;;  %v1702_v24 = vld [vmem:[%s2468_s3 + $0x28] sm:$0xff] (!%p192_p9)   ;;  %v1703_v29 = vld [vmem:[%s2468_s3 + $0x30] sm:$0xff] (!%p192_p9)   ;;  %s1316_s25 = sshll.u32 (!%p192_p9), %s216_s23, 7  ;;  %s1416_s30 = sshll.u32 (!%p192_p9), %s1951_s22, 11 }
  0x10   : > { %1556 = vmatprep.subr.bf16.mxu0 (!%p192_p9), %v1696_v1  ;;  %1646 = vmatpush3.bf16.msra.mxu1 (!%p192_p9), %v1697_v2  ;;  %v1704_v57 = vld [vmem:[%s2468_s3 + $0x38] sm:$0xff] (!%p192_p9)   ;;  %v2065_v58 = vld [vmem:[%s2467_s2] ss:$0 sm:$0xff] (!%p192_p9)  ;;  %s2365_s26 = scalar_lea.vmem (!%p192_p9), [#allocation2], %s1316_s25  ;;  %s2417_s9 = scalar_lea.hbm (!%p192_p9), %s2470_s5, %s1416_s30 }
  0x11   : > { %1639 = vmatprep.subr.bf16.mxu1 (!%p192_p9), %v1698_v3  ;;  %s1250_s6 = sshll.u32 (!%p192_p9), %s2365_s26, 4  ;;  %s2424_s22 = scalar_lea.sflag (!%p192_p9), [#allocation3], %s216_s23  ;;  %s2419_s6 = int_to_ptr.vmem [resolvable:$true] %s1250_s6 }
  0x12   : > { %s1833_s10 = scalar_lea.vmem (!%p192_p9), %s2419_s6, 2048  ;;  %s1897_s11 = smov (!%p192_p9), [#allocation2]  }
  0x13   : > { %1557 = vmatpush3.bf16.msra.mxu0 (!%p192_p9), %v1696_v1  ;;  %p1834_p11 = scmp.ne.s32.totalorder (!%p192_p9), %s2419_s6, %s1833_s10  ;;  %s1837_s12 = sshll.u32 (!%p192_p9), %s1897_s11, 4  ;;  %s1838_s12 = int_to_ptr.vmem [resolvable:$false] %s1837_s12 }
  0x14   : > { %1590 = vmatprep.subr.bf16.mxu0 (!%p192_p9), %v1697_v2  ;;  %1647 = vmatpush3.bf16.msra.mxu1 (!%p192_p9), %v1698_v3  ;;  %s1839_s13 = scalar_lea.vmem (!%p192_p9), %s1838_s12, 4096  ;;  %p1840_p0 = scmp.lt.s32.totalorder (!%p192_p9), %s2419_s6, %s1838_s12 }
  0x15   : > { %s2478_s7 = smov (!%p220_p10, %s1317_s7), 63  ;;  %1640 = vmatprep.subr.bf16.mxu1 %v1699_v4  ;;  %p1835_p12 = pnand %p1834_p11, %p1968_p5 }
  0x16   : > { %s1318_s14 = sshll.u32 %s2478_s7, 3  ;;  %p1841_p1 = scmp.lt.s32.totalorder %s1839_s13, %s1833_s10 }
  0x17   : > { %s1994_s17 = scalar_lea.vmem %s2465_s0, %s1318_s14  ;;  %p1836_p13 = pneg %p1835_p12 }
  0x18   : > { %v227_v5 = vld [vmem:[%s1994_s17] sm:$0xff]  ;;  %v228_v6 = vld [vmem:[%s1994_s17 + $0x8] sm:$0xff]  ;;  %v229_v7 = vld [vmem:[%s1994_s17 + $0x10] sm:$0xff]  ;;  %1648 = vmatpush3.bf16.msra.mxu1 %v1699_v4  ;;  %p1842_p2 = por %p1841_p1, %p1840_p0 }
  0x19   : > { %v259_v8 = vpack.c.bf16 %v228_v6, %v227_v5  ;;  %v230_v9 = vld [vmem:[%s1994_s17 + $0x18] sm:$0xff]  ;;  %v231_v10 = vld [vmem:[%s1994_s17 + $0x20] sm:$0xff]  ;;  %v232_v11 = vld [vmem:[%s1994_s17 + $0x28] sm:$0xff]  ;;  %1641 = vmatprep.subr.bf16.mxu1 %v1700_v16 }
  0x1a   : > { %v260_v12 = vpack.c.bf16 %v230_v9, %v229_v7  ;;  %v261_v13 = vpack.c.bf16 %v232_v11, %v231_v10  ;;  %v233_v14 = vld [vmem:[%s1994_s17 + $0x30] sm:$0xff]  ;;  %v234_v15 = vld [vmem:[%s1994_s17 + $0x38] sm:$0xff]  ;;  %v235_v17 = vld [vmem:[%s1994_s17 + $0x40] sm:$0xff]  ;;  %p1843_p3 = pnand %p1842_p2, %p1836_p13 }
  0x1b   : > { %1558 = vmatprep.mubr.msk.bf16.mxu0 %vm298_vm0, %v259_v8  ;;  %v236_v18 = vld [vmem:[%s1994_s17 + $0x48] sm:$0xff]  ;;  %v262_v19 = vpack.c.bf16 %v234_v15, %v233_v14  ;;  %v237_v22 = vld [vmem:[%s1994_s17 + $0x50] sm:$0xff]  ;;  %v238_v23 = vld [vmem:[%s1994_s17 + $0x58] sm:$0xff] }
  0x1c   : > { %1559 = vmatmul.mubr.msk.bf16.vlgmr.msra.gmra.mrb[0].mxu0 %vm298_vm0, %v260_v12  ;;  %v263_v20 = vpack.c.bf16 %v236_v18, %v235_v17  ;;  %1649 = vmatpush3.bf16.msra.mxu1 %v1700_v16  ;;  %v239_v25 = vld [vmem:[%s1994_s17 + $0x60] sm:$0xff]  ;;  %v240_v26 = vld [vmem:[%s1994_s17 + $0x68] sm:$0xff]  ;;  %v264_v27 = vpack.c.bf16 %v238_v23, %v237_v22  ;;  %v241_v30 = vld [vmem:[%s1994_s17 + $0x70] sm:$0xff] }
  0x1d   : > { %1562 = vmatprep.mubr.msk.bf16.mxu0 %vm298_vm0, %v261_v13  ;;  %1591 = vmatpush3.bf16.msra.mxu0 %v1697_v2  ;;  %v265_v28 = vpack.c.bf16 %v240_v26, %v239_v25  ;;  %v242_v31 = vld [vmem:[%s1994_s17 + $0x78] sm:$0xff]  ;;  %v243_v32 = vld [vmem:[%s1994_s17 + $0x80] sm:$0xff]  ;;  %v244_v33 = vld [vmem:[%s1994_s17 + $0x88] sm:$0xff] }
  0x1e   : > { %1592 = vmatprep.subr.bf16.mxu0 %v1698_v3  ;;  %1642 = vmatprep.subr.bf16.mxu1 %v1701_v21  ;;  %v266_v34 = vpack.c.bf16 %v242_v31, %v241_v30  ;;  %v267_v35 = vpack.c.bf16 %v244_v33, %v243_v32  ;;  %v245_v36 = vld [vmem:[%s1994_s17 + $0x90] sm:$0xff]  ;;  %v246_v37 = vld [vmem:[%s1994_s17 + $0x98] sm:$0xff]  ;;  %v247_v38 = vld [vmem:[%s1994_s17 + $0xa0] sm:$0xff] }
  0x1f   : > { %v248_v39 = vld [vmem:[%s1994_s17 + $0xa8] sm:$0xff]  ;;  %v268_v40 = vpack.c.bf16 %v246_v37, %v245_v36  ;;  %v249_v42 = vld [vmem:[%s1994_s17 + $0xb0] sm:$0xff]  ;;  %v250_v43 = vld [vmem:[%s1994_s17 + $0xb8] sm:$0xff] }
  0x20   : > { %1650 = vmatpush3.bf16.msra.mxu1 %v1701_v21  ;;  %v269_v41 = vpack.c.bf16 %v248_v39, %v247_v38  ;;  %v251_v44 = vld [vmem:[%s1994_s17 + $0xc0] sm:$0xff]  ;;  %v252_v45 = vld [vmem:[%s1994_s17 + $0xc8] sm:$0xff]  ;;  %v270_v46 = vpack.c.bf16 %v250_v43, %v249_v42  ;;  %v253_v48 = vld [vmem:[%s1994_s17 + $0xd0] sm:$0xff] }
  0x21   : > { %1593 = vmatpush3.bf16.msra.mxu0 %v1698_v3  ;;  %1643 = vmatprep.subr.bf16.mxu1 %v1702_v24  ;;  %v271_v47 = vpack.c.bf16 %v252_v45, %v251_v44  ;;  %v254_v49 = vld [vmem:[%s1994_s17 + $0xd8] sm:$0xff]  ;;  %v255_v50 = vld [vmem:[%s1994_s17 + $0xe0] sm:$0xff]  ;;  %v256_v51 = vld [vmem:[%s1994_s17 + $0xe8] sm:$0xff] }
  0x22   : > { %1594 = vmatprep.subr.bf16.mxu0 %v1699_v4  ;;  %v272_v52 = vpack.c.bf16 %v254_v49, %v253_v48  ;;  %v273_v53 = vpack.c.bf16 %v256_v51, %v255_v50  ;;  %v257_v54 = vld [vmem:[%s1994_s17 + $0xf0] sm:$0xff]  ;;  %v258_v55 = vld [vmem:[%s1994_s17 + $0xf8] sm:$0xff] }
  0x23   : > { %v274_v56 = vpack.c.bf16 %v258_v55, %v257_v54 }
  0x24   : > { %1563 = vmatmul.mubr.msk.bf16.gmra.mrb[4].mxu0 %vm298_vm0, %v262_v19  ;;  %1651 = vmatpush3.bf16.msra.mxu1 %v1702_v24 }
  0x25   : > { %1566 = vmatprep.mubr.msk.bf16.mxu0 %vm298_vm0, %v263_v20  ;;  %1595 = vmatpush3.bf16.msra.mxu0 %v1699_v4 }
  0x26   : > { %1596 = vmatprep.subr.bf16.mxu0 %v1700_v16  ;;  %1644 = vmatprep.subr.bf16.mxu1 %v1703_v29 }
  0x28   : > { %1652 = vmatpush3.bf16.msra.mxu1 %v1703_v29 }
  0x29   : > { %1597 = vmatpush3.bf16.msra.mxu0 %v1700_v16  ;;  %1645 = vmatprep.subr.bf16.mxu1 %v1704_v57 }
  0x2a   : > { %1598 = vmatprep.subr.bf16.mxu0 %v1701_v21 }
  0x2c   : > { %1567 = vmatmul.mubr.msk.bf16.gmra.mrb[8].mxu0 %vm298_vm0, %v264_v27  ;;  %1653 = vmatpush3.bf16.msra.mxu1 %v1704_v57 }
  0x2d   : > { %1570 = vmatprep.mubr.msk.bf16.mxu0 %vm298_vm0, %v265_v28  ;;  %1599 = vmatpush3.bf16.msra.mxu0 %v1701_v21 }
  0x2e   : > { %1600 = vmatprep.subr.bf16.mxu0 %v1702_v24 }
  0x31   : > { %1601 = vmatpush3.bf16.msra.mxu0 %v1702_v24 }
  0x32   : > { %1602 = vmatprep.subr.bf16.mxu0 %v1703_v29 }
  0x34   : > { %1571 = vmatmul.mubr.msk.bf16.gmra.mrb[12].mxu0 %vm298_vm0, %v266_v34 }
  0x35   : > { %1574 = vmatprep.mubr.msk.bf16.mxu0 %vm298_vm0, %v267_v35  ;;  %1603 = vmatpush3.bf16.msra.mxu0 %v1703_v29 }
  0x36   : > { %1604 = vmatprep.subr.bf16.mxu0 %v1704_v57 }
  0x39   : > { %1605 = vmatpush3.bf16.msra.mxu0 %v1704_v57 }
  0x3c   : > { %1575 = vmatmul.mubr.msk.bf16.gmra.mrb[16].mxu0 %vm298_vm0, %v268_v40 }
  0x3d   : > { %1578 = vmatprep.mubr.msk.bf16.mxu0 %vm298_vm0, %v269_v41 }
  0x44   : > { %1579 = vmatmul.mubr.msk.bf16.gmra.mrb[20].mxu0 %vm298_vm0, %v270_v46 }
  0x45   : > { %1582 = vmatprep.mubr.msk.bf16.mxu0 %vm298_vm0, %v271_v47 }
  0x4c   : > { %1583 = vmatmul.mubr.msk.bf16.gmra.mrb[24].mxu0 %vm298_vm0, %v272_v52 }
  0x4d   : > { %1586 = vmatprep.mubr.msk.bf16.mxu0 %vm298_vm0, %v273_v53 }
  0x54   : > { %1587 = vmatmul.mubr.msk.bf16.gmra.mrb[28].mxu0 %vm298_vm0, %v274_v56 }
  0xef   : > { %v1560_v59 = vpop.f32.mrb[0].mxu0 }
  0xf0   : > { %v390_v60 = vadd.f32 %v1560_v59, %v2065_v58  ;;  %v381_v61 = vpop.f32.mrb[1].mxu0 }
  0xf1   : > { %v382_v62 = vadd.f32 %v2065_v58, %v381_v61  ;;  %v1561_v63 = vpop.f32.mrb[2].mxu0 }
  0xf2   : > { %v393_v0 = vadd.f32 %v1561_v63, %v2065_v58  ;;  %v384_v1 = vpop.f32.mrb[3].mxu0  ;;  %v510_v3 = vmax.f32 %v390_v60, 0.0 }
  0xf3   : > { %v385_v2 = vadd.f32 %v2065_v58, %v384_v1  ;;  %v508_v5 = vmax.f32 %v382_v62, 0.0 }
  0xf4   : > { %v511_v4 = vmax.f32 %v393_v0, 0.0 }
  0xf5   : > { %v509_v6 = vmax.f32 %v385_v2, 0.0 }
  0xf6   : > { %v541_v7 = vpack.c.bf16 %v511_v4, %v510_v3 }
  0xf7   : > { %v540_v8 = vpack.c.bf16 %v509_v6, %v508_v5  ;;  %v1564_v9 = vpop.f32.mrb[4].mxu0 }
  0xf8   : > { %v406_v10 = vadd.f32 %v1564_v9, %v2065_v58  ;;  %v397_v11 = vpop.f32.mrb[5].mxu0 }
  0xf9   : > { %v398_v12 = vadd.f32 %v2065_v58, %v397_v11  ;;  %v1565_v13 = vpop.f32.mrb[6].mxu0  ;;  %1606 = vmatprep.mubr.bf16.mxu0 %v540_v8 }
  0xfa   : > { %v514_v14 = vmax.f32 %v406_v10, 0.0  ;;  %v409_v15 = vadd.f32 %v1565_v13, %v2065_v58  ;;  %v400_v16 = vpop.f32.mrb[7].mxu0  ;;  %1607 = vmatmul.mubr.bf16.vlgmr.msra.gmra.mrb[32].mxu0 %v541_v7 }
  0xfb   : > { %v401_v17 = vadd.f32 %v2065_v58, %v400_v16  ;;  %v512_v19 = vmax.f32 %v398_v12, 0.0 }
  0xfc   : > { %v515_v18 = vmax.f32 %v409_v15, 0.0 }
  0xfd   : > { %v513_v20 = vmax.f32 %v401_v17, 0.0 }
  0xfe   : > { %v543_v21 = vpack.c.bf16 %v515_v18, %v514_v14 }
  0xff   : > { %v1568_v22 = vpop.f32.mrb[8].mxu0  ;;  %v542_v23 = vpack.c.bf16 %v513_v20, %v512_v19 }
 0x100   : > { %v422_v24 = vadd.f32 %v1568_v22, %v2065_v58  ;;  %v413_v25 = vpop.f32.mrb[9].mxu0 }
 0x101   : > { %v414_v26 = vadd.f32 %v2065_v58, %v413_v25  ;;  %v1569_v27 = vpop.f32.mrb[10].mxu0  ;;  %1610 = vmatprep.mubr.bf16.mxu1 %v542_v23 }
 0x102   : > { %v518_v28 = vmax.f32 %v422_v24, 0.0  ;;  %v425_v29 = vadd.f32 %v1569_v27, %v2065_v58  ;;  %v416_v30 = vpop.f32.mrb[11].mxu0  ;;  %1611 = vmatmul.mubr.bf16.vlgmr.msra.gmra.mrb[0].mxu1 %v543_v21 }
 0x103   : > { %v417_v31 = vadd.f32 %v2065_v58, %v416_v30  ;;  %v516_v33 = vmax.f32 %v414_v26, 0.0 }
 0x104   : > { %v519_v32 = vmax.f32 %v425_v29, 0.0 }
 0x105   : > { %v517_v34 = vmax.f32 %v417_v31, 0.0 }
 0x106   : > { %v545_v35 = vpack.c.bf16 %v519_v32, %v518_v28 }
 0x107   : > { %v544_v36 = vpack.c.bf16 %v517_v34, %v516_v33  ;;  %v1572_v37 = vpop.f32.mrb[12].mxu0 }
 0x108   : > { %v438_v38 = vadd.f32 %v1572_v37, %v2065_v58  ;;  %v429_v39 = vpop.f32.mrb[13].mxu0 }
 0x109   : > { %v430_v40 = vadd.f32 %v2065_v58, %v429_v39  ;;  %v1573_v41 = vpop.f32.mrb[14].mxu0  ;;  %1614 = vmatprep.mubr.bf16.mxu1 %v544_v36 }
 0x10a   : > { %v522_v42 = vmax.f32 %v438_v38, 0.0  ;;  %v441_v43 = vadd.f32 %v1573_v41, %v2065_v58  ;;  %v432_v44 = vpop.f32.mrb[15].mxu0  ;;  %1615 = vmatmul.mubr.bf16.gmra.mrb[4].mxu1 %v545_v35 }
 0x10b   : > { %v433_v45 = vadd.f32 %v2065_v58, %v432_v44  ;;  %v520_v47 = vmax.f32 %v430_v40, 0.0  ;;  %v2102_v44 = vld [vmem:[%s2469_s4] ss:$0 sm:$0xff] }
 0x10c   : > { %v523_v46 = vmax.f32 %v441_v43, 0.0 }
 0x10d   : > { %v521_v48 = vmax.f32 %v433_v45, 0.0 }
 0x10e   : > { %v547_v49 = vpack.c.bf16 %v523_v46, %v522_v42 }
 0x10f   : > { %v546_v50 = vpack.c.bf16 %v521_v48, %v520_v47  ;;  %v1576_v51 = vpop.f32.mrb[16].mxu0 }
 0x110   : > { %v454_v52 = vadd.f32 %v1576_v51, %v2065_v58  ;;  %v445_v53 = vpop.f32.mrb[17].mxu0 }
 0x111   : > { %v446_v54 = vadd.f32 %v2065_v58, %v445_v53  ;;  %v1577_v55 = vpop.f32.mrb[18].mxu0  ;;  %1618 = vmatprep.mubr.bf16.mxu1 %v546_v50 }
 0x112   : > { %v526_v56 = vmax.f32 %v454_v52, 0.0  ;;  %v457_v57 = vadd.f32 %v1577_v55, %v2065_v58  ;;  %v448_v59 = vpop.f32.mrb[19].mxu0  ;;  %1619 = vmatmul.mubr.bf16.gmra.mrb[8].mxu1 %v547_v49 }
 0x113   : > { %v449_v60 = vadd.f32 %v2065_v58, %v448_v59  ;;  %v524_v62 = vmax.f32 %v446_v54, 0.0 }
 0x114   : > { %v527_v61 = vmax.f32 %v457_v57, 0.0 }
 0x115   : > { %v525_v63 = vmax.f32 %v449_v60, 0.0 }
 0x116   : > { %v549_v0 = vpack.c.bf16 %v527_v61, %v526_v56 }
 0x117   : > { %v548_v1 = vpack.c.bf16 %v525_v63, %v524_v62  ;;  %v1580_v2 = vpop.f32.mrb[20].mxu0 }
 0x118   : > { %v470_v3 = vadd.f32 %v1580_v2, %v2065_v58  ;;  %v461_v4 = vpop.f32.mrb[21].mxu0 }
 0x119   : > { %v462_v5 = vadd.f32 %v2065_v58, %v461_v4  ;;  %v1581_v6 = vpop.f32.mrb[22].mxu0  ;;  %1622 = vmatprep.mubr.bf16.mxu1 %v548_v1 }
 0x11a   : > { %v530_v7 = vmax.f32 %v470_v3, 0.0  ;;  %v473_v8 = vadd.f32 %v1581_v6, %v2065_v58  ;;  %v464_v9 = vpop.f32.mrb[23].mxu0  ;;  %1623 = vmatmul.mubr.bf16.gmra.mrb[12].mxu1 %v549_v0 }
 0x11b   : > { %v465_v10 = vadd.f32 %v2065_v58, %v464_v9  ;;  %v528_v12 = vmax.f32 %v462_v5, 0.0 }
 0x11c   : > { %v531_v11 = vmax.f32 %v473_v8, 0.0 }
 0x11d   : > { %v529_v13 = vmax.f32 %v465_v10, 0.0 }
 0x11e   : > { %v551_v14 = vpack.c.bf16 %v531_v11, %v530_v7 }
 0x11f   : > { %v550_v15 = vpack.c.bf16 %v529_v13, %v528_v12  ;;  %v1584_v16 = vpop.f32.mrb[24].mxu0 }
 0x120   : > { %v486_v17 = vadd.f32 %v1584_v16, %v2065_v58  ;;  %v477_v18 = vpop.f32.mrb[25].mxu0 }
 0x121   : > { %v478_v19 = vadd.f32 %v2065_v58, %v477_v18  ;;  %v1585_v20 = vpop.f32.mrb[26].mxu0  ;;  %1626 = vmatprep.mubr.bf16.mxu1 %v550_v15 }
 0x122   : > { %v534_v21 = vmax.f32 %v486_v17, 0.0  ;;  %v489_v22 = vadd.f32 %v1585_v20, %v2065_v58  ;;  %v480_v23 = vpop.f32.mrb[27].mxu0  ;;  %1627 = vmatmul.mubr.bf16.gmra.mrb[16].mxu1 %v551_v14 }
 0x123   : > { %v481_v24 = vadd.f32 %v2065_v58, %v480_v23  ;;  %v532_v26 = vmax.f32 %v478_v19, 0.0 }
 0x124   : > { %v535_v25 = vmax.f32 %v489_v22, 0.0 }
 0x125   : > { %v533_v27 = vmax.f32 %v481_v24, 0.0 }
 0x126   : > { %v553_v28 = vpack.c.bf16 %v535_v25, %v534_v21 }
 0x127   : > { %v552_v29 = vpack.c.bf16 %v533_v27, %v532_v26  ;;  %v1588_v30 = vpop.f32.mrb[28].mxu0 }
 0x128   : > { %v502_v31 = vadd.f32 %v1588_v30, %v2065_v58  ;;  %v493_v32 = vpop.f32.mrb[29].mxu0 }
 0x129   : > { %v494_v33 = vadd.f32 %v2065_v58, %v493_v32  ;;  %v1589_v34 = vpop.f32.mrb[30].mxu0  ;;  %1630 = vmatprep.mubr.bf16.mxu1 %v552_v29 }
 0x12a   : > { %v538_v35 = vmax.f32 %v502_v31, 0.0  ;;  %v505_v36 = vadd.f32 %v1589_v34, %v2065_v58  ;;  %v496_v37 = vpop.f32.mrb[31].mxu0  ;;  %1631 = vmatmul.mubr.bf16.gmra.mrb[20].mxu1 %v553_v28 }
 0x12b   : > { %v497_v38 = vadd.f32 %v2065_v58, %v496_v37  ;;  %v536_v40 = vmax.f32 %v494_v33, 0.0 }
 0x12c   : > { %v539_v39 = vmax.f32 %v505_v36, 0.0 }
 0x12d   : > { %v537_v41 = vmax.f32 %v497_v38, 0.0 }
 0x12e   : > { %v555_v42 = vpack.c.bf16 %v539_v39, %v538_v35 }
 0x12f   : > { %v554_v43 = vpack.c.bf16 %v537_v41, %v536_v40 }
 0x131   : > { %1634 = vmatprep.mubr.bf16.mxu1 %v554_v43 }
 0x132   : > { %1635 = vmatmul.mubr.bf16.gmra.mrb[24].mxu1 %v555_v42 }
 0x1cd   : > { %v1608_v45 = vpop.f32.mrb[32].mxu0 }
 0x1ce   : > { %v2105_v46 = vadd.f32 %v1608_v45, %v2102_v44  ;;  %v661_v47 = vpop.f32.mrb[33].mxu0 }
 0x1cf   : > { %v2108_v48 = vadd.f32 %v2102_v44, %v661_v47  ;;  %v1609_v58 = vpop.f32.mrb[34].mxu0 }
 0x1d0   : > { %792 = vmax.xlane.f32.xlu1 %v2105_v46  ;;  %v664_v49 = vpop.f32.mrb[35].mxu0  ;;  %v2113_v50 = vadd.f32 %v1609_v58, %v2102_v44 }
 0x1d1   : > { %788 = vmax.xlane.f32.xlu0 %v2108_v48  ;;  %v2116_v51 = vadd.f32 %v2102_v44, %v664_v49 }
 0x1d4   : > { %794 = vmax.xlane.f32.xlu1 %v2113_v50 }
 0x1d5   : > { %v1612_v52 = vpop.f32.mrb[0].mxu1  ;;  %790 = vmax.xlane.f32.xlu0 %v2116_v51 }
 0x1d6   : > { %v2121_v53 = vadd.f32 %v1612_v52, %v2102_v44  ;;  %v677_v54 = vpop.f32.mrb[1].mxu1 }
 0x1d7   : > { %v1613_v55 = vpop.f32.mrb[2].mxu1  ;;  %v2129_v59 = vadd.f32 %v2102_v44, %v677_v54 }
 0x1d8   : > { %v2124_v56 = vadd.f32 %v1613_v55, %v2102_v44  ;;  %v680_v57 = vpop.f32.mrb[3].mxu1 }
 0x1d9   : > { %800 = vmax.xlane.f32.xlu0 %v2121_v53  ;;  %v2132_v60 = vadd.f32 %v2102_v44, %v680_v57 }
 0x1da   : > { %802 = vmax.xlane.f32.xlu1 %v2124_v56 }
 0x1dd   : > { %v1616_v61 = vpop.f32.mrb[4].mxu1  ;;  %796 = vmax.xlane.f32.xlu0 %v2129_v59 }
 0x1de   : > { %v2136_v62 = vadd.f32 %v1616_v61, %v2102_v44  ;;  %v693_v63 = vpop.f32.mrb[5].mxu1  ;;  %798 = vmax.xlane.f32.xlu1 %v2132_v60 }
 0x1df   : > { %v1617_v0 = vpop.f32.mrb[6].mxu1  ;;  %v2145_v3 = vadd.f32 %v2102_v44, %v693_v63 }
 0x1e0   : > { %v2140_v1 = vadd.f32 %v1617_v0, %v2102_v44  ;;  %v696_v2 = vpop.f32.mrb[7].mxu1 }
 0x1e1   : > { %808 = vmax.xlane.f32.xlu0 %v2136_v62  ;;  %v2148_v4 = vadd.f32 %v2102_v44, %v696_v2 }
 0x1e2   : > { %810 = vmax.xlane.f32.xlu1 %v2140_v1 }
 0x1e5   : > { %v1620_v5 = vpop.f32.mrb[8].mxu1  ;;  %804 = vmax.xlane.f32.xlu0 %v2145_v3 }
 0x1e6   : > { %v2152_v6 = vadd.f32 %v1620_v5, %v2102_v44  ;;  %v709_v7 = vpop.f32.mrb[9].mxu1  ;;  %806 = vmax.xlane.f32.xlu1 %v2148_v4 }
 0x1e7   : > { %v1621_v8 = vpop.f32.mrb[10].mxu1  ;;  %v2161_v11 = vadd.f32 %v2102_v44, %v709_v7 }
 0x1e8   : > { %v2156_v9 = vadd.f32 %v1621_v8, %v2102_v44  ;;  %v712_v10 = vpop.f32.mrb[11].mxu1 }
 0x1e9   : > { %816 = vmax.xlane.f32.xlu0 %v2152_v6  ;;  %v2164_v12 = vadd.f32 %v2102_v44, %v712_v10 }
 0x1ea   : > { %818 = vmax.xlane.f32.xlu1 %v2156_v9 }
 0x1ed   : > { %v1624_v13 = vpop.f32.mrb[12].mxu1  ;;  %812 = vmax.xlane.f32.xlu0 %v2161_v11 }
 0x1ee   : > { %v2168_v14 = vadd.f32 %v1624_v13, %v2102_v44  ;;  %v725_v15 = vpop.f32.mrb[13].mxu1  ;;  %814 = vmax.xlane.f32.xlu1 %v2164_v12 }
 0x1ef   : > { %v1625_v16 = vpop.f32.mrb[14].mxu1  ;;  %v2177_v19 = vadd.f32 %v2102_v44, %v725_v15 }
 0x1f0   : > { %v2172_v17 = vadd.f32 %v1625_v16, %v2102_v44  ;;  %v728_v18 = vpop.f32.mrb[15].mxu1 }
 0x1f1   : > { %824 = vmax.xlane.f32.xlu0 %v2168_v14  ;;  %v2180_v20 = vadd.f32 %v2102_v44, %v728_v18 }
 0x1f2   : > { %826 = vmax.xlane.f32.xlu1 %v2172_v17 }
 0x1f5   : > { %v1628_v21 = vpop.f32.mrb[16].mxu1  ;;  %820 = vmax.xlane.f32.xlu0 %v2177_v19 }
 0x1f6   : > { %v2184_v22 = vadd.f32 %v1628_v21, %v2102_v44  ;;  %v741_v23 = vpop.f32.mrb[17].mxu1  ;;  %822 = vmax.xlane.f32.xlu1 %v2180_v20 }
 0x1f7   : > { %v1629_v24 = vpop.f32.mrb[18].mxu1  ;;  %v2193_v27 = vadd.f32 %v2102_v44, %v741_v23 }
 0x1f8   : > { %v2188_v25 = vadd.f32 %v1629_v24, %v2102_v44  ;;  %v744_v26 = vpop.f32.mrb[19].mxu1 }
 0x1f9   : > { %832 = vmax.xlane.f32.xlu0 %v2184_v22  ;;  %v2196_v28 = vadd.f32 %v2102_v44, %v744_v26 }
 0x1fa   : > { %834 = vmax.xlane.f32.xlu1 %v2188_v25 }
 0x1fd   : > { %v1632_v29 = vpop.f32.mrb[20].mxu1  ;;  %828 = vmax.xlane.f32.xlu0 %v2193_v27 }
 0x1fe   : > { %v2200_v30 = vadd.f32 %v1632_v29, %v2102_v44  ;;  %v757_v31 = vpop.f32.mrb[21].mxu1  ;;  %830 = vmax.xlane.f32.xlu1 %v2196_v28 }
 0x1ff   : > { %v1633_v32 = vpop.f32.mrb[22].mxu1  ;;  %v2209_v35 = vadd.f32 %v2102_v44, %v757_v31 }
 0x200   : > { %v2204_v33 = vadd.f32 %v1633_v32, %v2102_v44  ;;  %v760_v34 = vpop.f32.mrb[23].mxu1 }
 0x201   : > { %840 = vmax.xlane.f32.xlu0 %v2200_v30  ;;  %v2212_v36 = vadd.f32 %v2102_v44, %v760_v34 }
 0x202   : > { %842 = vmax.xlane.f32.xlu1 %v2204_v33 }
 0x205   : > { %v1636_v37 = vpop.f32.mrb[24].mxu1  ;;  %836 = vmax.xlane.f32.xlu0 %v2209_v35 }
 0x206   : > { %v773_v38 = vpop.f32.mrb[25].mxu1  ;;  %838 = vmax.xlane.f32.xlu1 %v2212_v36  ;;  %v2224_v43 = vadd.f32 %v1636_v37, %v2102_v44 }
 0x207   : > { %v2217_v39 = vadd.f32 %v2102_v44, %v773_v38  ;;  %v1637_v40 = vpop.f32.mrb[26].mxu1 }
 0x208   : > { %v776_v41 = vpop.f32.mrb[27].mxu1  ;;  %v2228_v45 = vadd.f32 %v1637_v40, %v2102_v44 }
 0x209   : > { %v2220_v42 = vadd.f32 %v2102_v44, %v776_v41  ;;  %844 = vmax.xlane.f32.xlu0 %v2217_v39 }
 0x20b   : > { %846 = vmax.xlane.f32.xlu1 %v2220_v42 }
 0x20d   : > { %848 = vmax.xlane.f32.xlu0 %v2224_v43 }
 0x20f   : > { %850 = vmax.xlane.f32.xlu1 %v2228_v45 }
 0x25d   : > { %v793_v47 = vpop.xlane.xlu1 %792 }
 0x25e   : > { %v854_v58 = vsub.f32 %v2105_v46, %v793_v47  ;;  %v789_v49 = vpop.xlane.xlu0 %788 }
 0x25f   : > { %v852_v52 = vsub.f32 %v2108_v48, %v789_v49 }
 0x260   : > { %v888_v54 = vmul.f32 1.442695, %v854_v58 }
 0x261   : > { %v884_v55 = vmul.f32 1.442695, %v852_v52  ;;  %v795_v57 = vpop.xlane.xlu1 %794 }
 0x262   : > { %1705 = vpow2.f32 %v888_v54  ;;  %v855_v61 = vsub.f32 %v2113_v50, %v795_v57  ;;  %v791_v63 = vpop.xlane.xlu0 %790 }
 0x263   : > { %v853_v44 = vsub.f32 %v2116_v51, %v791_v63  ;;  %1707 = vpow2.f32 %v884_v55 }
 0x264   : > { %v890_v0 = vmul.f32 1.442695, %v855_v61 }
 0x265   : > { %v886_v2 = vmul.f32 1.442695, %v853_v44 }
 0x266   : > { %1709 = vpow2.f32 %v890_v0  ;;  %v801_v5 = vpop.xlane.xlu0 %800 }
 0x267   : > { %v858_v7 = vsub.f32 %v2121_v53, %v801_v5  ;;  %v803_v46 = vpop.xlane.xlu1 %802  ;;  %1711 = vpow2.f32 %v886_v2 }
 0x268   : > { %v859_v8 = vsub.f32 %v2124_v56, %v803_v46 }
 0x269   : > { %v896_v48 = vmul.f32 1.442695, %v858_v7 }
 0x26a   : > { %v898_v10 = vmul.f32 1.442695, %v859_v8  ;;  %v797_v13 = vpop.xlane.xlu0 %796 }
 0x26b   : > { %1713 = vpow2.f32 %v896_v48  ;;  %v856_v50 = vsub.f32 %v2129_v59, %v797_v13  ;;  %v799_v15 = vpop.xlane.xlu1 %798 }
 0x26c   : > { %v2239_v16 = vpop.eup %1705  ;;  %v857_v51 = vsub.f32 %v2132_v60, %v799_v15  ;;  %1715 = vpow2.f32 %v898_v10 }
 0x26d   : > { %v892_v18 = vmul.f32 1.442695, %v856_v50  ;;  %952 = vadd.xlane.f32.xlu0 %v2239_v16  ;;  %v2243_v23 = vpop.eup %1707 }
 0x26e   : > { %v894_v53 = vmul.f32 1.442695, %v857_v51  ;;  %v809_v21 = vpop.xlane.xlu0 %808 }
 0x26f   : > { %1717 = vpow2.f32 %v892_v18  ;;  %v862_v56 = vsub.f32 %v2136_v62, %v809_v21  ;;  %v811_v24 = vpop.xlane.xlu1 %810 }
 0x270   : > { %v2246_v26 = vpop.eup %1709  ;;  %v863_v59 = vsub.f32 %v2140_v1, %v811_v24  ;;  %1719 = vpow2.f32 %v894_v53 }
 0x271   : > { %v904_v29 = vmul.f32 1.442695, %v862_v56  ;;  %954 = vadd.xlane.f32.xlu1 %v2246_v26  ;;  %948 = vadd.xlane.f32.xlu0 %v2243_v23  ;;  %v2252_v37 = vpop.eup %1711 }
 0x272   : > { %v906_v60 = vmul.f32 1.442695, %v863_v59  ;;  %v805_v31 = vpop.xlane.xlu0 %804 }
 0x273   : > { %1721 = vpow2.f32 %v904_v29  ;;  %v860_v32 = vsub.f32 %v2145_v3, %v805_v31  ;;  %v807_v34 = vpop.xlane.xlu1 %806 }
 0x274   : > { %v861_v62 = vsub.f32 %v2148_v4, %v807_v34  ;;  %1723 = vpow2.f32 %v906_v60 }
 0x275   : > { %v2255_v38 = vpop.eup %1713  ;;  %v900_v40 = vmul.f32 1.442695, %v860_v32  ;;  %950 = vadd.xlane.f32.xlu1 %v2252_v37 }
 0x276   : > { %v902_v1 = vmul.f32 1.442695, %v861_v62  ;;  %960 = vadd.xlane.f32.xlu0 %v2255_v38  ;;  %v817_v41 = vpop.xlane.xlu0 %816  ;;  %v2260_v3 = vpop.eup %1715 }
 0x277   : > { %1725 = vpow2.f32 %v900_v40  ;;  %v866_v47 = vsub.f32 %v2152_v6, %v817_v41  ;;  %v819_v58 = vpop.xlane.xlu1 %818 }
 0x278   : > { %v867_v49 = vsub.f32 %v2156_v9, %v819_v58  ;;  %1727 = vpow2.f32 %v902_v1 }
 0x279   : > { %v2263_v52 = vpop.eup %1717  ;;  %v912_v4 = vmul.f32 1.442695, %v866_v47  ;;  %962 = vadd.xlane.f32.xlu1 %v2260_v3 }
 0x27a   : > { %v914_v54 = vmul.f32 1.442695, %v867_v49  ;;  %956 = vadd.xlane.f32.xlu0 %v2263_v52  ;;  %v813_v55 = vpop.xlane.xlu0 %812  ;;  %v2268_v6 = vpop.eup %1719 }
 0x27b   : > { %1729 = vpow2.f32 %v912_v4  ;;  %v864_v57 = vsub.f32 %v2161_v11, %v813_v55  ;;  %v815_v61 = vpop.xlane.xlu1 %814 }
 0x27c   : > { %v865_v63 = vsub.f32 %v2164_v12, %v815_v61  ;;  %1731 = vpow2.f32 %v914_v54 }
 0x27d   : > { %v2271_v44 = vpop.eup %1721  ;;  %v908_v9 = vmul.f32 1.442695, %v864_v57  ;;  %958 = vadd.xlane.f32.xlu1 %v2268_v6 }
 0x27e   : > { %v910_v0 = vmul.f32 1.442695, %v865_v63  ;;  %968 = vadd.xlane.f32.xlu0 %v2271_v44  ;;  %v825_v2 = vpop.xlane.xlu0 %824  ;;  %v2276_v11 = vpop.eup %1723 }
 0x27f   : > { %1733 = vpow2.f32 %v908_v9  ;;  %v870_v5 = vsub.f32 %v2168_v14, %v825_v2  ;;  %v827_v7 = vpop.xlane.xlu1 %826 }
 0x280   : > { %v871_v46 = vsub.f32 %v2172_v17, %v827_v7  ;;  %1735 = vpow2.f32 %v910_v0 }
 0x281   : > { %v2279_v8 = vpop.eup %1725  ;;  %v920_v12 = vmul.f32 1.442695, %v870_v5  ;;  %970 = vadd.xlane.f32.xlu1 %v2276_v11 }
 0x282   : > { %v922_v48 = vmul.f32 1.442695, %v871_v46  ;;  %964 = vadd.xlane.f32.xlu0 %v2279_v8  ;;  %v821_v10 = vpop.xlane.xlu0 %820  ;;  %v2284_v14 = vpop.eup %1727 }
 0x283   : > { %1737 = vpow2.f32 %v920_v12  ;;  %v868_v13 = vsub.f32 %v2177_v19, %v821_v10  ;;  %v823_v50 = vpop.xlane.xlu1 %822 }
 0x284   : > { %v869_v15 = vsub.f32 %v2180_v20, %v823_v50  ;;  %1739 = vpow2.f32 %v922_v48 }
 0x285   : > { %v2287_v51 = vpop.eup %1729  ;;  %v916_v17 = vmul.f32 1.442695, %v868_v13  ;;  %966 = vadd.xlane.f32.xlu1 %v2284_v14 }
 0x286   : > { %v918_v18 = vmul.f32 1.442695, %v869_v15  ;;  %976 = vadd.xlane.f32.xlu0 %v2287_v51  ;;  %v833_v53 = vpop.xlane.xlu0 %832  ;;  %v2292_v19 = vpop.eup %1731 }
 0x287   : > { %1741 = vpow2.f32 %v916_v17  ;;  %v874_v21 = vsub.f32 %v2184_v22, %v833_v53  ;;  %v835_v56 = vpop.xlane.xlu1 %834 }
 0x288   : > { %v875_v24 = vsub.f32 %v2188_v25, %v835_v56  ;;  %1743 = vpow2.f32 %v918_v18 }
 0x289   : > { %v2295_v59 = vpop.eup %1733  ;;  %v928_v20 = vmul.f32 1.442695, %v874_v21  ;;  %978 = vadd.xlane.f32.xlu1 %v2292_v19 }
 0x28a   : > { %v930_v29 = vmul.f32 1.442695, %v875_v24  ;;  %972 = vadd.xlane.f32.xlu0 %v2295_v59  ;;  %v829_v60 = vpop.xlane.xlu0 %828  ;;  %v2300_v22 = vpop.eup %1735 }
 0x28b   : > { %1745 = vpow2.f32 %v928_v20  ;;  %v872_v31 = vsub.f32 %v2193_v27, %v829_v60  ;;  %v831_v32 = vpop.xlane.xlu1 %830 }
 0x28c   : > { %v873_v34 = vsub.f32 %v2196_v28, %v831_v32  ;;  %1747 = vpow2.f32 %v930_v29 }
 0x28d   : > { %v2303_v62 = vpop.eup %1737  ;;  %v924_v25 = vmul.f32 1.442695, %v872_v31  ;;  %974 = vadd.xlane.f32.xlu1 %v2300_v22 }
 0x28e   : > { %v926_v40 = vmul.f32 1.442695, %v873_v34  ;;  %984 = vadd.xlane.f32.xlu0 %v2303_v62  ;;  %v841_v1 = vpop.xlane.xlu0 %840  ;;  %v2308_v27 = vpop.eup %1739 }
 0x28f   : > { %1749 = vpow2.f32 %v924_v25  ;;  %v878_v41 = vsub.f32 %v2200_v30, %v841_v1  ;;  %v843_v47 = vpop.xlane.xlu1 %842 }
 0x290   : > { %v879_v58 = vsub.f32 %v2204_v33, %v843_v47  ;;  %1751 = vpow2.f32 %v926_v40 }
 0x291   : > { %v2311_v49 = vpop.eup %1741  ;;  %v936_v28 = vmul.f32 1.442695, %v878_v41  ;;  %986 = vadd.xlane.f32.xlu1 %v2308_v27 }
 0x292   : > { %v938_v4 = vmul.f32 1.442695, %v879_v58  ;;  %980 = vadd.xlane.f32.xlu0 %v2311_v49  ;;  %v837_v54 = vpop.xlane.xlu0 %836  ;;  %v2316_v30 = vpop.eup %1743 }
 0x293   : > { %1753 = vpow2.f32 %v936_v28  ;;  %v876_v55 = vsub.f32 %v2209_v35, %v837_v54  ;;  %v839_v57 = vpop.xlane.xlu1 %838 }
 0x294   : > { %v877_v61 = vsub.f32 %v2212_v36, %v839_v57  ;;  %1755 = vpow2.f32 %v938_v4 }
 0x295   : > { %v2319_v63 = vpop.eup %1745  ;;  %v932_v33 = vmul.f32 1.442695, %v876_v55  ;;  %982 = vadd.xlane.f32.xlu1 %v2316_v30 }
 0x296   : > { %v934_v9 = vmul.f32 1.442695, %v877_v61  ;;  %992 = vadd.xlane.f32.xlu0 %v2319_v63  ;;  %v845_v0 = vpop.xlane.xlu0 %844  ;;  %v2324_v5 = vpop.eup %1747 }
 0x297   : > { %1757 = vpow2.f32 %v932_v33  ;;  %v880_v2 = vsub.f32 %v2217_v39, %v845_v0 }
 0x298   : > { %v847_v35 = vpop.xlane.xlu1 %846  ;;  %1759 = vpow2.f32 %v934_v9 }
 0x299   : > { %v2326_v7 = vpop.eup %1749  ;;  %v940_v46 = vmul.f32 1.442695, %v880_v2  ;;  %v881_v36 = vsub.f32 %v2220_v42, %v847_v35  ;;  %994 = vadd.xlane.f32.xlu1 %v2324_v5 }
 0x29a   : > { %988 = vadd.xlane.f32.xlu0 %v2326_v7  ;;  %v849_v12 = vpop.xlane.xlu0 %848  ;;  %v2332_v13 = vpop.eup %1751 }
 0x29b   : > { %1761 = vpow2.f32 %v940_v46  ;;  %v942_v48 = vmul.f32 1.442695, %v881_v36  ;;  %v882_v10 = vsub.f32 %v2224_v43, %v849_v12 }
 0x29c   : > { %v851_v39 = vpop.xlane.xlu1 %850 }
 0x29d   : > { %v2334_v50 = vpop.eup %1753  ;;  %1763 = vpow2.f32 %v942_v48  ;;  %v944_v15 = vmul.f32 1.442695, %v882_v10  ;;  %v883_v17 = vsub.f32 %v2228_v45, %v851_v39  ;;  %990 = vadd.xlane.f32.xlu1 %v2332_v13 }
 0x29e   : > { %1000 = vadd.xlane.f32.xlu0 %v2334_v50  ;;  %v2339_v18 = vpop.eup %1755 }
 0x29f   : > { %1765 = vpow2.f32 %v944_v15  ;;  %v946_v42 = vmul.f32 1.442695, %v883_v17 }
 0x2a1   : > { %v2341_v53 = vpop.eup %1757  ;;  %1767 = vpow2.f32 %v946_v42  ;;  %1002 = vadd.xlane.f32.xlu1 %v2339_v18 }
 0x2a2   : > { %996 = vadd.xlane.f32.xlu0 %v2341_v53  ;;  %v2345_v43 = vpop.eup %1759 }
 0x2a5   : > { %v2347_v21 = vpop.eup %1761  ;;  %998 = vadd.xlane.f32.xlu1 %v2345_v43 }
 0x2a6   : > { %1004 = vadd.xlane.f32.xlu0 %v2347_v21 }
 0x2a7   : > { %v2351_v45 = vpop.eup %1763 }
 0x2a9   : > { %v2353_v56 = vpop.eup %1765  ;;  %1006 = vadd.xlane.f32.xlu1 %v2351_v45 }
 0x2aa   : > { %1008 = vadd.xlane.f32.xlu0 %v2353_v56 }
 0x2ab   : > { %v2357_v24 = vpop.eup %1767 }
 0x2ad   : > { %1010 = vadd.xlane.f32.xlu1 %v2357_v24 }
 0x2fa   : > { %v953_v20 = vpop.xlane.xlu0 %952 }
 0x2fb   : > { %1769 = vrcp.f32 %v953_v20 }
 0x2fe   : > { %v955_v29 = vpop.xlane.xlu1 %954  ;;  %v949_v60 = vpop.xlane.xlu0 %948 }
 0x2ff   : > { %1771 = vrcp.f32 %v955_v29 }
 0x300   : > { %1773 = vrcp.f32 %v949_v60 }
 0x302   : > { %v951_v31 = vpop.xlane.xlu1 %950 }
 0x303   : > { %1775 = vrcp.f32 %v951_v31  ;;  %v961_v32 = vpop.xlane.xlu0 %960 }
 0x304   : > { %1777 = vrcp.f32 %v961_v32 }
 0x305   : > { %v1770_v25 = vpop.eup %1769 }
 0x306   : > { %v963_v34 = vpop.xlane.xlu1 %962  ;;  %v1046_v41 = vmul.f32 %v1770_v25, %v2239_v16 }
 0x307   : > { %1779 = vrcp.f32 %v963_v34  ;;  %v957_v40 = vpop.xlane.xlu0 %956 }
 0x308   : > { %1781 = vrcp.f32 %v957_v40 }
 0x309   : > { %v1772_v1 = vpop.eup %1771 }
 0x30a   : > { %v1047_v47 = vmul.f32 %v1772_v1, %v2246_v26  ;;  %v959_v58 = vpop.xlane.xlu1 %958  ;;  %v1774_v28 = vpop.eup %1773 }
 0x30b   : > { %1783 = vrcp.f32 %v959_v58  ;;  %v969_v4 = vpop.xlane.xlu0 %968  ;;  %v1044_v57 = vmul.f32 %v1774_v28, %v2243_v23 }
 0x30c   : > { %v1425_v54 = vpack.c.bf16 %v1047_v47, %v1046_v41  ;;  %1785 = vrcp.f32 %v969_v4 }
 0x30d   : > { %v1776_v55 = vpop.eup %1775 }
 0x30e   : > { %1497 = vst [vmem:[%s2365_s26 + $0x8] sm:$0xff] %v1425_v54   ;;  %v1045_v61 = vmul.f32 %v1776_v55, %v2252_v37  ;;  %v971_v33 = vpop.xlane.xlu1 %970  ;;  %v1778_v16 = vpop.eup %1777 }
 0x30f   : > { %1787 = vrcp.f32 %v971_v33  ;;  %v965_v26 = vpop.xlane.xlu0 %964  ;;  %v1050_v2 = vmul.f32 %v1778_v16, %v2255_v38 }
 0x310   : > { %v1420_v9 = vpack.c.bf16 %v1045_v61, %v1044_v57  ;;  %1789 = vrcp.f32 %v965_v26 }
 0x311   : > { %v1780_v0 = vpop.eup %1779 }
 0x312   : > { %1421 = vst [vmem:[%s2365_s26] sm:$0xff] %v1420_v9   ;;  %v1051_v35 = vmul.f32 %v1780_v0, %v2260_v3  ;;  %v967_v46 = vpop.xlane.xlu1 %966  ;;  %v1782_v36 = vpop.eup %1781 }
 0x313   : > { %1791 = vrcp.f32 %v967_v46  ;;  %v977_v23 = vpop.xlane.xlu0 %976  ;;  %v1048_v48 = vmul.f32 %v1782_v36, %v2263_v52 }
 0x314   : > { %v1435_v12 = vpack.c.bf16 %v1051_v35, %v1050_v2  ;;  %1793 = vrcp.f32 %v977_v23 }
 0x315   : > { %v1784_v37 = vpop.eup %1783 }
 0x316   : > { %1499 = vst [vmem:[%s2365_s26 + $0x18] sm:$0xff] %v1435_v12   ;;  %v1049_v10 = vmul.f32 %v1784_v37, %v2268_v6  ;;  %v979_v39 = vpop.xlane.xlu1 %978  ;;  %v1786_v15 = vpop.eup %1785 }
 0x317   : > { %1795 = vrcp.f32 %v979_v39  ;;  %v973_v38 = vpop.xlane.xlu0 %972  ;;  %v1054_v42 = vmul.f32 %v1786_v15, %v2271_v44 }
 0x318   : > { %v1430_v17 = vpack.c.bf16 %v1049_v10, %v1048_v48  ;;  %1797 = vrcp.f32 %v973_v38 }
 0x319   : > { %v1788_v3 = vpop.eup %1787 }
 0x31a   : > { %1498 = vst [vmem:[%s2365_s26 + $0x10] sm:$0xff] %v1430_v17   ;;  %v1055_v20 = vmul.f32 %v1788_v3, %v2276_v11  ;;  %v975_v29 = vpop.xlane.xlu1 %974  ;;  %v1790_v60 = vpop.eup %1789 }
 0x31b   : > { %1799 = vrcp.f32 %v975_v29  ;;  %v985_v52 = vpop.xlane.xlu0 %984  ;;  %v1052_v32 = vmul.f32 %v1790_v60, %v2279_v8 }
 0x31c   : > { %v1445_v31 = vpack.c.bf16 %v1055_v20, %v1054_v42  ;;  %1801 = vrcp.f32 %v985_v52 }
 0x31d   : > { %v1792_v6 = vpop.eup %1791 }
 0x31e   : > { %1501 = vst [vmem:[%s2365_s26 + $0x28] sm:$0xff] %v1445_v31   ;;  %v1053_v34 = vmul.f32 %v1792_v6, %v2284_v14  ;;  %v987_v25 = vpop.xlane.xlu1 %986  ;;  %v1794_v40 = vpop.eup %1793 }
 0x31f   : > { %1803 = vrcp.f32 %v987_v25  ;;  %v981_v44 = vpop.xlane.xlu0 %980  ;;  %v1058_v41 = vmul.f32 %v1794_v40, %v2287_v51 }
 0x320   : > { %v1440_v1 = vpack.c.bf16 %v1053_v34, %v1052_v32  ;;  %1805 = vrcp.f32 %v981_v44 }
 0x321   : > { %v1796_v11 = vpop.eup %1795 }
 0x322   : > { %1500 = vst [vmem:[%s2365_s26 + $0x20] sm:$0xff] %v1440_v1   ;;  %v1059_v47 = vmul.f32 %v1796_v11, %v2292_v19  ;;  %v983_v58 = vpop.xlane.xlu1 %982  ;;  %v1798_v28 = vpop.eup %1797 }
 0x323   : > { %1807 = vrcp.f32 %v983_v58  ;;  %v993_v8 = vpop.xlane.xlu0 %992  ;;  %v1056_v54 = vmul.f32 %v1798_v28, %v2295_v59 }
 0x324   : > { %v1455_v4 = vpack.c.bf16 %v1059_v47, %v1058_v41  ;;  %1809 = vrcp.f32 %v993_v8 }
 0x325   : > { %v1800_v14 = vpop.eup %1799 }
 0x326   : > { %1503 = vst [vmem:[%s2365_s26 + $0x38] sm:$0xff] %v1455_v4   ;;  %v1057_v55 = vmul.f32 %v1800_v14, %v2300_v22  ;;  %v995_v57 = vpop.xlane.xlu1 %994  ;;  %v1802_v61 = vpop.eup %1801 }
 0x327   : > { %1811 = vrcp.f32 %v995_v57  ;;  %v989_v51 = vpop.xlane.xlu0 %988  ;;  %v1062_v16 = vmul.f32 %v1802_v61, %v2303_v62 }
 0x328   : > { %v1450_v33 = vpack.c.bf16 %v1057_v55, %v1056_v54  ;;  %1813 = vrcp.f32 %v989_v51 }
 0x329   : > { %v1804_v19 = vpop.eup %1803 }
 0x32a   : > { %1502 = vst [vmem:[%s2365_s26 + $0x30] sm:$0xff] %v1450_v33   ;;  %v1063_v26 = vmul.f32 %v1804_v19, %v2308_v27  ;;  %v991_v9 = vpop.xlane.xlu1 %990  ;;  %v1806_v0 = vpop.eup %1805 }
 0x32b   : > { %1815 = vrcp.f32 %v991_v9  ;;  %v1001_v59 = vpop.xlane.xlu0 %1000  ;;  %v1060_v35 = vmul.f32 %v1806_v0, %v2311_v49 }
 0x32c   : > { %v1465_v2 = vpack.c.bf16 %v1063_v26, %v1062_v16  ;;  %1817 = vrcp.f32 %v1001_v59 }
 0x32d   : > { %v1808_v22 = vpop.eup %1807 }
 0x32e   : > { %1505 = vst [vmem:[%s2365_s26 + $0x48] sm:$0xff] %v1465_v2   ;;  %v1061_v46 = vmul.f32 %v1808_v22, %v2316_v30  ;;  %v1003_v36 = vpop.xlane.xlu1 %1002  ;;  %v1810_v23 = vpop.eup %1809 }
 0x32f   : > { %1819 = vrcp.f32 %v1003_v36  ;;  %v997_v62 = vpop.xlane.xlu0 %996  ;;  %v1066_v37 = vmul.f32 %v1810_v23, %v2319_v63 }
 0x330   : > { %v1460_v12 = vpack.c.bf16 %v1061_v46, %v1060_v35  ;;  %1821 = vrcp.f32 %v997_v62 }
 0x331   : > { %v1812_v27 = vpop.eup %1811 }
 0x332   : > { %1504 = vst [vmem:[%s2365_s26 + $0x40] sm:$0xff] %v1460_v12   ;;  %v1067_v48 = vmul.f32 %v1812_v27, %v2324_v5  ;;  %v999_v10 = vpop.xlane.xlu1 %998  ;;  %v1814_v39 = vpop.eup %1813 }
 0x333   : > { %1823 = vrcp.f32 %v999_v10  ;;  %v1005_v49 = vpop.xlane.xlu0 %1004  ;;  %v1064_v38 = vmul.f32 %v1814_v39, %v2326_v7 }
 0x334   : > { %v1475_v15 = vpack.c.bf16 %v1067_v48, %v1066_v37  ;;  %1825 = vrcp.f32 %v1005_v49 }
 0x335   : > { %v1816_v30 = vpop.eup %1815 }
 0x336   : > { %1507 = vst [vmem:[%s2365_s26 + $0x58] sm:$0xff] %v1475_v15   ;;  %v1065_v17 = vmul.f32 %v1816_v30, %v2332_v13  ;;  %v1007_v3 = vpop.xlane.xlu1 %1006  ;;  %v1818_v42 = vpop.eup %1817 }
 0x337   : > { %1827 = vrcp.f32 %v1007_v3  ;;  %v1009_v63 = vpop.xlane.xlu0 %1008  ;;  %v1070_v29 = vmul.f32 %v1818_v42, %v2334_v50 }
 0x338   : > { %v1470_v20 = vpack.c.bf16 %v1065_v17, %v1064_v38  ;;  %1829 = vrcp.f32 %v1009_v63 }
 0x339   : > { %v1820_v5 = vpop.eup %1819 }
 0x33a   : > { %1506 = vst [vmem:[%s2365_s26 + $0x50] sm:$0xff] %v1470_v20   ;;  %v1071_v60 = vmul.f32 %v1820_v5, %v2339_v18  ;;  %v1011_v52 = vpop.xlane.xlu1 %1010  ;;  %v1822_v31 = vpop.eup %1821 }
 0x33b   : > { %1831 = vrcp.f32 %v1011_v52  ;;  %v1068_v6 = vmul.f32 %v1822_v31, %v2341_v53 }
 0x33c   : > { %v1485_v7 = vpack.c.bf16 %v1071_v60, %v1070_v29 }
 0x33d   : > { %v1824_v13 = vpop.eup %1823 }
 0x33e   : > { %1509 = vst [vmem:[%s2365_s26 + $0x68] sm:$0xff] %v1485_v7   ;;  %v1069_v32 = vmul.f32 %v1824_v13, %v2345_v43  ;;  %v1826_v34 = vpop.eup %1825 }
 0x33f   : > { %v1072_v50 = vmul.f32 %v1826_v34, %v2347_v21 }
 0x340   : > { %v1480_v25 = vpack.c.bf16 %v1069_v32, %v1068_v6 }
 0x341   : > { %v1828_v40 = vpop.eup %1827 }
 0x342   : > { %1508 = vst [vmem:[%s2365_s26 + $0x60] sm:$0xff] %v1480_v25   ;;  %v1073_v18 = vmul.f32 %v1828_v40, %v2351_v45  ;;  %v1830_v44 = vpop.eup %1829 }
 0x343   : > { %v1074_v53 = vmul.f32 %v1830_v44, %v2353_v56 }
 0x344   : > { %v1490_v1 = vpack.c.bf16 %v1073_v18, %v1072_v50 }
 0x345   : > { %v1832_v11 = vpop.eup %1831 }
 0x346   : > { %1510 = vst [vmem:[%s2365_s26 + $0x70] sm:$0xff] %v1490_v1   ;;  %v1075_v43 = vmul.f32 %v1832_v11, %v2357_v24 }
 0x348   : > { %v1495_v21 = vpack.c.bf16 %v1075_v43, %v1074_v53 }
 0x34a   : > { %1511 = vst [vmem:[%s2365_s26 + $0x78] sm:$0xff] %v1495_v21  }
 0x34b   : > { %1846 = shalt.err (!%p1843_p3)
}
 0x34c   : > { %s1847_s14 = scalar_lea.hbm %s2417_s9, 2048  ;;  %s1851_s17 = scalar_lea.hbm %s2470_s5, 4096 }
 0x34d   : > { %p1848_p4 = scmp.ne.s32.totalorder %s2417_s9, %s1847_s14  ;;  %p1852_p9 = scmp.lt.u32.totalorder %s2417_s9, %s2470_s5 }
 0x34e   : > { %p1853_p10 = scmp.lt.u32.totalorder %s1851_s17, %s1847_s14  ;;  %p1855_p12 = scmp.lt.u32.totalorder %s1847_s14, %s2417_s9 }
 0x34f   : > { %p1849_p7 = pnand %p1848_p4, %p1968_p5 }
 0x350   : > { %p1854_p11 = por %p1853_p10, %p1852_p9 }
 0x351   : > { %p1850_p8 = pneg %p1849_p7 }
 0x352   : > { %p1856_p13 = por %p1855_p12, %p1854_p11 }
 0x354   : > { %p1857_p0 = pnand %p1856_p13, %p1850_p8 }
 0x356   : > { %1860 = shalt.err (!%p1857_p0)
}
 0x357   : > { %s1898_s26 = smov 64   ;;  %s1899_s30 = smov 4  }
 0x358   : > { %1654 = dma.vmem_to_hbm [thread:$0]  (%p1968_p5), %s2419_s6, 2048, %s2417_s9, %s2424_s22, %s1898_s26, %s1898_s26, %s1899_s30  }
 0x359 PF: > { %p1660_p1 = scmp.ge.s32.totalorder %s1895_s21, 2  ;;  %s1265_s7 = sand.u32 1, %s1883_s18  }
 0x35a   : > { %s1266_s8 = scalar_lea.sflag [#allocation3], %s1265_s7 }
 0x35b   : > { %p1657_p2 = pnand %p1660_p1, %p1972_p6 }
 0x35d   : > { %1878 = dma.done.wait (!%p1657_p2), %s1266_s8, 2048  }
 0x35e   : > { %1880 = vsyncadd (!%p1657_p2), %s1266_s8, 4294965248  ;;  %p15_p3 = scmp.ge.s32.totalorder %s1955_s24, 4   ;;  %s2473_s18 = smov %s1887_s19 }
 0x35f   : > { %s2474_s19 = smov %s1891_s20  ;;  %s2475_s20 = smov %s1966_s27 }
 0x360   : > { %s2476_s21 = smov %s1955_s24  ;;  %17 = sbr.rel (!%p15_p3) target bundleno = 3 (0x3), region = 75 }
 0x367   :  { %1271 = vsyncpa [#allocation3], 1 }
 0x368   :  { %1273 = vsyncpa [#allocation3 + $0x1], 1 }

</bundles_post_ra>
